<compile_context>
chip_gen: v7x
topology: tpu7x:2x2x1
jax: 0.10.0
libtpu: 0.0.40
codegen_flags: <defaults>
</compile_context>

<pallas_src>
import functools

import jax
import jax.numpy as jnp
from jax.experimental import pallas as pl
from jax.experimental.pallas import tpu as pltpu


# ----------------------------------------------------------------------------
# Pallas kernel: lane-dense partial sum-of-squares accumulation.
#   g_ref : (R, tn)   input chunk (any float dtype), tn = 128 * 2^m
#   o_ref : (R, 128)  f32 per-lane partial sum of squares for this slab
# ----------------------------------------------------------------------------
def _gp_partial_kernel(g_ref, o_ref):
    k = pl.program_id(1)                     # reduction step within this slab

    @pl.when(k == 0)
    def _():
        o_ref[...] = jnp.zeros_like(o_ref)

    g = g_ref[...].astype(jnp.float32)       # (R, tn)
    sq = g * g
    # Tree-reduce the lane dimension down to 128 with 128-aligned static
    # slices -> pure VPU adds, log-depth dependency chain, no relayout.
    while sq.shape[1] > 128:
        half = sq.shape[1] // 2
        sq = sq[:, :half] + sq[:, half:]
    o_ref[...] += sq                          # lane-dense accumulate (R, 128)


def _pow2x128_at_most(x):
    v = 128
    while v * 2 <= x:
        v *= 2
    return v


def _pow2x128_at_least(x):
    v = 128
    while v < x:
        v *= 2
    return v


def gradient_penalty_from_grad(grad_flat, *, target_block_bytes=2 << 20):
    """grad_flat: (B, N) float array -> scalar WGAN-GP penalty (f32)."""
    B, N = grad_flat.shape
    itemsize = grad_flat.dtype.itemsize
    sublane_min = {1: 32, 2: 16, 4: 8}.get(itemsize, 8)

    # Sublane fill: split each row into S sub-rows (sumsq is additive).
    S = max(1, sublane_min // B)
    R = B * S
    M_needed = -(-N // S)                     # elements per sub-row (ceil)

    # Feature tile: largest 128*2^m with R*tn*itemsize <= target_block_bytes.
    tn_cap = _pow2x128_at_most(max(128, target_block_bytes // (R * itemsize)))
    if M_needed <= tn_cap:                    # whole-array fast path
        tn = _pow2x128_at_least(M_needed)
        m_blocks = 1
    else:
        tn = tn_cap
        m_blocks = -(-M_needed // tn)

    # Outer "parallel" slab axis: lets both TensorCores work on v7x.
    num_slabs = 2 if m_blocks >= 4 else 1
    k_per_slab = -(-m_blocks // num_slabs)
    padded_M = num_slabs * k_per_slab * tn
    padded_N = padded_M * S

    if padded_N != N:                         # zeros add nothing to sumsq
        grad_flat = jnp.pad(grad_flat, ((0, 0), (0, padded_N - N)))
    g2d = grad_flat.reshape(R, padded_M)      # free (contiguous) reshape

    partial = pl.pallas_call(
        _gp_partial_kernel,
        out_shape=jax.ShapeDtypeStruct((num_slabs, R, 128), jnp.float32),
        grid_spec=pltpu.PrefetchScalarGridSpec(
            num_scalar_prefetch=0,
            grid=(num_slabs, k_per_slab),
            in_specs=[pl.BlockSpec((R, tn),
                                   lambda i, k: (0, i * k_per_slab + k))],
            out_specs=pl.BlockSpec((None, R, 128), lambda i, k: (i, 0, 0)),
        ),
        compiler_params=pltpu.CompilerParams(
            dimension_semantics=("parallel", "arbitrary")),
    )(g2d)

    # Tiny epilogue in plain JAX: combine slabs + lanes + sub-rows, then
    # sqrt / (norm - 1)^2 / batch mean.
    per_sub = jnp.sum(partial, axis=(0, 2))           # (R,)
    per_row = per_sub.reshape(B, S).sum(axis=1)       # (B,) sum of squares
    norm = jnp.sqrt(per_row)                          # (B,) L2 norms
    return jnp.mean((norm - 1.0) ** 2)


# ----------------------------------------------------------------------------
# GradientPenaltyLoss.forward equivalent.
#   critic_fn: interp (B,C,H,W) -> interp_crit (any shape)
#   grad_outputs = ones_like(interp_crit)  (what get_grad_outputs produces)
# ----------------------------------------------------------------------------
def gradient_penalty_loss(critic_fn, interp):
    # TODO(synk): torch.autograd.grad(create_graph=True) has no Pallas
    # equivalent; the VJP is computed with jax.vjp outside the kernel.
    interp_crit, vjp_fn = jax.vjp(critic_fn, interp)
    grad_outputs = jnp.ones_like(interp_crit)          # get_grad_outputs(...)
    (grad_interp,) = vjp_fn(grad_outputs)              # torch.autograd.grad(...)
    B = grad_interp.shape[0]
    grad_flat = grad_interp.reshape(B, -1)             # .view(B, -1)
    return gradient_penalty_from_grad(grad_flat)


# ----------------------------------------------------------------------------
# Deterministic synthetic critic (stands in for the discriminator whose graph
# produced interp_crit in the PyTorch usage).
# ----------------------------------------------------------------------------
def make_critic(key, C):
    w = jax.random.normal(key, (C,), dtype=jnp.float32) * 0.1

    def critic(x):                                     # x: (B, C, H, W) NCHW
        pooled = jnp.mean(x, axis=(2, 3))              # (B, C)
        return jnp.tanh(pooled @ w)[:, None]           # (B, 1) critic score

    return critic


if __name__ == "__main__":
    key = jax.random.PRNGKey(0)
    k_x, k_w, k_g = jax.random.split(key, 3)

    # --- full forward-pass check (vjp glue + kernel), small shapes ----------
    B, C, H, W = 2, 4, 16, 16
    interp = jax.random.normal(k_x, (B, C, H, W), dtype=jnp.float32)
    critic = make_critic(k_w, C)

    loss = jax.jit(functools.partial(gradient_penalty_loss, critic))(interp)
    jax.block_until_ready(loss)

    icrit, vjp_fn = jax.vjp(critic, interp)
    (g,) = vjp_fn(jnp.ones_like(icrit))
    ref = jnp.mean((jnp.linalg.norm(g.reshape(B, -1), axis=1) - 1.0) ** 2)
    assert jnp.allclose(loss, ref, rtol=2e-5, atol=1e-5), (loss, ref)

    # --- direct reduction check: padding, multi-step grid, 2 slabs ----------
    g2 = jax.random.normal(k_g, (3, 5000), dtype=jnp.float32)
    loss2 = gradient_penalty_from_grad(g2, target_block_bytes=4096)
    jax.block_until_ready(loss2)
    ref2 = jnp.mean((jnp.linalg.norm(g2, axis=1) - 1.0) ** 2)
    assert jnp.allclose(loss2, ref2, rtol=2e-5, atol=1e-5), (loss2, ref2)

    print("KERNEL_OK")
</pallas_src>

<mosaic_0001>
module attributes {stable_mosaic.version = 11 : i64} {
  func.func @_gp_partial_kernel(%arg0: i32, %arg1: i32, %arg2: memref<8x256xf32, #tpu.memory_space<vmem>>, %arg3: memref<1x8x128xf32, #tpu.memory_space<vmem>>) attributes {dimension_semantics = [#tpu.dimension_semantics<parallel>, #tpu.dimension_semantics<arbitrary>], iteration_bounds = array<i64: 1, 1>, scalar_prefetch = 0 : i64, scratch_operands = 0 : i64, tpu.core_type = #tpu.core_type<tc>, window_params = [{transform_indices = @transform_0, window_bounds = array<i64: 8, 256>}, {transform_indices = @transform_1, window_bounds = array<i64: 1, 8, 128>}]} {
    %c0_i32 = arith.constant 0 : i32
    %0 = arith.cmpi eq, %arg1, %c0_i32 : i32
    %1 = arith.extui %0 : i1 to i32
    %c0_i32_0 = arith.constant 0 : i32
    %2 = arith.cmpi ne, %1, %c0_i32_0 : i32
    scf.if %2 {
      %cst = arith.constant 0.000000e+00 : f32
      %14 = vector.broadcast %cst : f32 to vector<8x128xf32>
      %c0_8 = arith.constant 0 : index
      %c0_9 = arith.constant 0 : index
      %c0_10 = arith.constant 0 : index
      %15 = vector.load %arg3[%c0_8, %c0_9, %c0_10] : memref<1x8x128xf32, #tpu.memory_space<vmem>>, vector<1x8x128xf32>
      %16 = vector.shape_cast %15 : vector<1x8x128xf32> to vector<8x128xf32>
      %17 = vector.shape_cast %14 : vector<8x128xf32> to vector<1x8x128xf32>
      tpu.vector_store %arg3[%c0_8, %c0_9, %c0_10], %17 {strides = array<i32>} : memref<1x8x128xf32, #tpu.memory_space<vmem>>, vector<1x8x128xf32>,
    } else {
    }
    %c0 = arith.constant 0 : index
    %c0_1 = arith.constant 0 : index
    %3 = vector.load %arg2[%c0, %c0_1] : memref<8x256xf32, #tpu.memory_space<vmem>>, vector<8x256xf32>
    %4 = arith.mulf %3, %3 : vector<8x256xf32>
    %5 = vector.extract_strided_slice %4 {offsets = [0, 0], sizes = [8, 128], strides = [1, 1]} : vector<8x256xf32> to vector<8x128xf32>
    %6 = vector.extract_strided_slice %4 {offsets = [0, 128], sizes = [8, 128], strides = [1, 1]} : vector<8x256xf32> to vector<8x128xf32>
    %7 = arith.addf %5, %6 : vector<8x128xf32>
    %c0_2 = arith.constant 0 : index
    %c0_3 = arith.constant 0 : index
    %c0_4 = arith.constant 0 : index
    %8 = vector.load %arg3[%c0_2, %c0_3, %c0_4] : memref<1x8x128xf32, #tpu.memory_space<vmem>>, vector<1x8x128xf32>
    %9 = vector.shape_cast %8 : vector<1x8x128xf32> to vector<8x128xf32>
    %10 = arith.addf %9, %7 : vector<8x128xf32>
    %c0_5 = arith.constant 0 : index
    %c0_6 = arith.constant 0 : index
    %c0_7 = arith.constant 0 : index
    %11 = vector.load %arg3[%c0_5, %c0_6, %c0_7] : memref<1x8x128xf32, #tpu.memory_space<vmem>>, vector<1x8x128xf32>
    %12 = vector.shape_cast %11 : vector<1x8x128xf32> to vector<8x128xf32>
    %13 = vector.shape_cast %10 : vector<8x128xf32> to vector<1x8x128xf32>
    tpu.vector_store %arg3[%c0_5, %c0_6, %c0_7], %13 {strides = array<i32>} : memref<1x8x128xf32, #tpu.memory_space<vmem>>, vector<1x8x128xf32>,
    return
  }
  func.func @transform_0(%arg0: i32, %arg1: i32) -> (i32, i32) {
    %c1_i32 = arith.constant 1 : i32
    %0 = arith.muli %arg0, %c1_i32 : i32
    %1 = arith.addi %0, %arg1 : i32
    %c0_i32 = arith.constant 0 : i32
    %c0_i32_0 = arith.constant 0 : i32
    return %c0_i32, %1 : i32, i32
  }
  func.func @transform_1(%arg0: i32, %arg1: i32) -> (i32, i32, i32) {
    %c0_i32 = arith.constant 0 : i32
    %c0_i32_0 = arith.constant 0 : i32
    %c0_i32_1 = arith.constant 0 : i32
    return %arg0, %c0_i32, %c0_i32_0 : i32, i32, i32
  }
}

</mosaic_0001>

<bundles_post_ra>
// kernel: gradient_penalty_loss.1
= control target key start
LH: loop header
LB: loop body
LE: loop exit
PB: predicated region body
PF: predicated region fallthrough
CT: control target
= control target key end

     0   :  { %s73_s0 = inlined_call_operand.vmem [shape: f32[8,256], index: 0, kind: input, shape index: {}]   ;;  %s74_s1 = inlined_call_operand.vmem [shape: f32[1,8,128], index: 1, kind: output, shape index: {}]  }
   0x1   :  { %v35_v0 = vld [vmem:[%s73_s0] sm:$0xff]  ;;  %v36_v1 = vld [vmem:[%s73_s0 + $0x8] sm:$0xff] }
   0x2   :  { %v37_v2 = vmul.f32 %v35_v0, %v35_v0  ;;  %v38_v3 = vmul.f32 %v36_v1, %v36_v1 }
   0x4   :  { %v39_v4 = vadd.f32 %v38_v3, %v37_v2 }
   0x6   :  { %42 = vst [vmem:[%s74_s1] sm:$0xff] %v39_v4 }

</bundles_post_ra>
